<compile_context>
chip_gen: v7x
topology: tpu7x:2x2x1
jax: 0.10.0
libtpu: 0.0.40
codegen_flags: <defaults>
</compile_context>

<pallas_src>
import functools
import math

import jax
import jax.numpy as jnp
from jax import lax
from jax.experimental import pallas as pl
from jax.experimental.pallas import tpu as pltpu

_MAX_TS = 512      # spatial (lane) tile cap, multiple of 128
_MAX_TR = 256      # row (sublane) tile cap, multiple of 8
_NEG_INF = float("-inf")


def get_positive_k(k, n):
    # Mirrors TopKMaxPooling.get_positive_k exactly.
    if k <= 0:
        return 0
    elif k < 1:
        return round(k * n)
    elif k > n:
        return int(n)
    else:
        return int(k)


def _round_up(a, m):
    return (a + m - 1) // m * m


def _topk_pool_kernel(x_ref, o_ref, state_ref, *, k, kpad):
    """Grid = (row_tiles, spatial_tiles); spatial is the reduction ('arbitrary') axis."""
    s = pl.program_id(1)
    ns = pl.num_programs(1)

    @pl.when(s == 0)
    def _init():
        state_ref[...] = jnp.full(state_ref.shape, _NEG_INF, state_ref.dtype)

    vals = x_ref[...].astype(jnp.float32)                        # [TR, TS]

    if k == 1:
        # Pure spatial max pooling (the kmax=1.0 default).
        tile_max = jnp.max(vals, axis=-1, keepdims=True)         # [TR, 1]
        state_ref[...] = jnp.maximum(state_ref[...], tile_max)
    else:
        # Exact streaming top-k: new_state = top-k of (running_state U tile).
        work = jnp.concatenate([vals, state_ref[...]], axis=-1)  # [TR, TS+kpad]
        tr, width = work.shape
        col = lax.broadcasted_iota(jnp.int32, (tr, width), 1)
        kcol = lax.broadcasted_iota(jnp.int32, (tr, kpad), 1)

        def extract(j, carry):
            w, newtop = carry
            cur = jnp.max(w, axis=-1, keepdims=True)             # [TR, 1]
            # Mask out exactly the FIRST occurrence of the current max
            # (exact multiset semantics, matches torch.sort under ties).
            first = jnp.min(jnp.where(w == cur, col, width),
                            axis=-1, keepdims=True)
            w = jnp.where(col == first, _NEG_INF, w)
            newtop = jnp.where(kcol == j, cur, newtop)
            return w, newtop

        newtop0 = jnp.full((tr, kpad), _NEG_INF, jnp.float32)
        if k <= 16:
            # Short static loop: unroll at trace time for scheduler visibility.
            carry = (work, newtop0)
            for j in range(k):
                carry = extract(j, carry)
            newtop = carry[1]
        else:
            _, newtop = lax.fori_loop(0, k, extract, (work, newtop0))
        state_ref[...] = newtop

    @pl.when(s == ns - 1)
    def _finalize():
        st = state_ref[...]
        if k == 1:
            total = st
        else:
            kcol = lax.broadcasted_iota(jnp.int32, st.shape, 1)
            total = jnp.sum(jnp.where(kcol < k, st, 0.0),
                            axis=-1, keepdims=True)
        o_ref[...] = (total * (1.0 / k)).astype(o_ref.dtype)


def topk_max_pooling(x, kmax=1.0):
    """Pallas TopKMaxPooling: x [B, C, H, W] -> [B, C]."""
    B, C, H, W = x.shape
    n = H * W
    k = get_positive_k(kmax, n)
    if k < 1:
        raise ValueError(f"kmax={kmax} resolves to k={k}; need k >= 1")

    R = B * C
    x2d = x.reshape(R, n)                       # free reshape, no transpose

    TS = min(_round_up(n, 128), _MAX_TS)        # lanes: multiple of 128
    TR = min(_round_up(R, 8), _MAX_TR)          # sublanes: multiple of 8
    R_pad = _round_up(R, TR)
    S_pad = _round_up(n, TS)
    if R_pad != R or S_pad != n:
        # -inf spatial padding never enters the top-k (k <= n);
        # padded rows are dropped in the wrapper.
        x2d = jnp.pad(x2d, ((0, R_pad - R), (0, S_pad - n)),
                      constant_values=_NEG_INF)

    kpad = 1 if k == 1 else _round_up(k, 128)   # lane-aligned running-top-k state
    grid = (R_pad // TR, S_pad // TS)

    out = pl.pallas_call(
        functools.partial(_topk_pool_kernel, k=k, kpad=kpad),
        out_shape=jax.ShapeDtypeStruct((R_pad, 1), x.dtype),
        grid=grid,
        in_specs=[pl.BlockSpec((TR, TS), lambda r, s: (r, s))],
        # Output block is constant across the spatial axis -> resident accumulator.
        out_specs=pl.BlockSpec((TR, 1), lambda r, s: (r, 0)),
        scratch_shapes=[pltpu.VMEM((TR, kpad), jnp.float32)],
        compiler_params=pltpu.CompilerParams(
            dimension_semantics=("parallel", "arbitrary"),
            vmem_limit_bytes=32 * 1024 * 1024),
    )(x2d)

    return out[:R, 0].reshape(B, C)


# ----------------------------------------------------------------------------
# Pure-JAX reference (identical semantics to the PyTorch module)
# ----------------------------------------------------------------------------
def reference_topk_max_pooling(x, kmax=1.0):
    B, C, H, W = x.shape
    n = H * W
    k = get_positive_k(kmax, n)
    flat = x.reshape(B, C, n)
    topv, _ = jax.lax.top_k(flat, k)            # sorted descending, top-k
    return jnp.mean(topv.astype(jnp.float32), axis=-1).astype(x.dtype)


if __name__ == "__main__":
    key = jax.random.PRNGKey(0)
    ka, kb = jax.random.split(key)

    # Config 1: shapes that tile exactly and exercise spatial streaming
    # (n = 1024 -> two 512-wide lane tiles, 80 rows in one sublane tile).
    x1 = jax.random.normal(ka, (2, 40, 32, 32), jnp.float32)
    # Config 2: ragged shapes exercising both row padding and -inf lane padding.
    x2 = jax.random.normal(kb, (2, 5, 9, 11), jnp.float32)

    cases = [
        (x1, 1.0),    # module default: kmax=1.0 -> spatial max
        (x1, 20),     # query2label-style top-20 mean
        (x1, 0.25),   # fractional kmax -> k = round(0.25 * 1024) = 256
        (x2, 1.0),
        (x2, 3),
        (x2, 0.5),
    ]
    for x, kmax in cases:
        out = jax.block_until_ready(topk_max_pooling(x, kmax))
        ref = reference_topk_max_pooling(x, kmax)
        assert out.shape == (x.shape[0], x.shape[1]), (out.shape, x.shape)
        assert bool(jnp.allclose(out, ref, rtol=1e-5, atol=1e-5)), \
            f"mismatch for shape={x.shape}, kmax={kmax}"

    print("KERNEL_OK")
</pallas_src>

<mosaic_0001>
module attributes {stable_mosaic.version = 11 : i64} {
  func.func @_topk_pool_kernel(%arg0: i32, %arg1: i32, %arg2: memref<80x512xf32, #tpu.memory_space<vmem>>, %arg3: memref<80x1xf32, #tpu.memory_space<vmem>>, %arg4: memref<80x1xf32, #tpu.memory_space<vmem>>) attributes {dimension_semantics = [#tpu.dimension_semantics<parallel>, #tpu.dimension_semantics<arbitrary>], iteration_bounds = array<i64: 1, 2>, scalar_prefetch = 0 : i64, scratch_operands = 1 : i64, tpu.core_type = #tpu.core_type<tc>, window_params = [{transform_indices = @transform_0, window_bounds = array<i64: 80, 512>}, {transform_indices = @transform_1, window_bounds = array<i64: 80, 1>}]} {
    %c0_i32 = arith.constant 0 : i32
    %0 = arith.cmpi eq, %arg1, %c0_i32 : i32
    %1 = arith.extui %0 : i1 to i32
    %c0_i32_0 = arith.constant 0 : i32
    %2 = arith.cmpi ne, %1, %c0_i32_0 : i32
    scf.if %2 {
      %cst_7 = arith.constant 0xFF800000 : f32
      %12 = vector.broadcast %cst_7 : f32 to vector<80x1xf32>
      %c0_8 = arith.constant 0 : index
      %c0_9 = arith.constant 0 : index
      %13 = vector.load %arg4[%c0_8, %c0_9] : memref<80x1xf32, #tpu.memory_space<vmem>>, vector<80x1xf32>
      tpu.vector_store %arg4[%c0_8, %c0_9], %12 {strides = array<i32>} : memref<80x1xf32, #tpu.memory_space<vmem>>, vector<80x1xf32>,
    } else {
    }
    %c0 = arith.constant 0 : index
    %c0_1 = arith.constant 0 : index
    %3 = vector.load %arg2[%c0, %c0_1] : memref<80x512xf32, #tpu.memory_space<vmem>>, vector<80x512xf32>
    %cst = arith.constant dense<0xFF800000> : vector<80xf32>
    %4 = vector.multi_reduction <maximumf>, %3, %cst [1] : vector<80x512xf32> to vector<80xf32>
    %5 = vector.shape_cast %4 : vector<80xf32> to vector<80x1xf32>
    %c0_2 = arith.constant 0 : index
    %c0_3 = arith.constant 0 : index
    %6 = vector.load %arg4[%c0_2, %c0_3] : memref<80x1xf32, #tpu.memory_space<vmem>>, vector<80x1xf32>
    %7 = arith.maximumf %6, %5 : vector<80x1xf32>
    %c0_4 = arith.constant 0 : index
    %c0_5 = arith.constant 0 : index
    %8 = vector.load %arg4[%c0_4, %c0_5] : memref<80x1xf32, #tpu.memory_space<vmem>>, vector<80x1xf32>
    tpu.vector_store %arg4[%c0_4, %c0_5], %7 {strides = array<i32>} : memref<80x1xf32, #tpu.memory_space<vmem>>, vector<80x1xf32>,
    %c1_i32 = arith.constant 1 : i32
    %9 = arith.cmpi eq, %arg1, %c1_i32 : i32
    %10 = arith.extui %9 : i1 to i32
    %c0_i32_6 = arith.constant 0 : i32
    %11 = arith.cmpi ne, %10, %c0_i32_6 : i32
    scf.if %11 {
      %c0_7 = arith.constant 0 : index
      %c0_8 = arith.constant 0 : index
      %12 = vector.load %arg4[%c0_7, %c0_8] : memref<80x1xf32, #tpu.memory_space<vmem>>, vector<80x1xf32>
      %cst_9 = arith.constant 1.000000e+00 : f32
      %13 = vector.broadcast %cst_9 : f32 to vector<80x1xf32>
      %14 = arith.mulf %12, %13 : vector<80x1xf32>
      %c0_10 = arith.constant 0 : index
      %c0_11 = arith.constant 0 : index
      %15 = vector.load %arg3[%c0_10, %c0_11] : memref<80x1xf32, #tpu.memory_space<vmem>>, vector<80x1xf32>
      tpu.vector_store %arg3[%c0_10, %c0_11], %14 {strides = array<i32>} : memref<80x1xf32, #tpu.memory_space<vmem>>, vector<80x1xf32>,
    } else {
    }
    return
  }
  func.func @transform_0(%arg0: i32, %arg1: i32) -> (i32, i32) {
    %c0_i32 = arith.constant 0 : i32
    return %arg0, %arg1 : i32, i32
  }
  func.func @transform_1(%arg0: i32, %arg1: i32) -> (i32, i32) {
    %c0_i32 = arith.constant 0 : i32
    %c0_i32_0 = arith.constant 0 : i32
    return %arg0, %c0_i32 : i32, i32
  }
}

</mosaic_0001>

<bundles_post_ra>
// kernel: tpu_custom_call.1
= control target key start
LH: loop header
LB: loop body
LE: loop exit
PB: predicated region body
PF: predicated region fallthrough
CT: control target
= control target key end

     0   :  { %6 = vsyncpa [#allocation4], 0  ;;  %s773_s0 = inlined_call_operand.hbm [shape: f32[80,1024], index: 0, kind: input, shape index: {}]   ;;  %s774_s1 = inlined_call_operand.vmem [shape: f32[80,1], index: 1, kind: output, shape index: {}]  }
   0x1   :  { %8 = vsyncpa [#allocation4 + $0x1], 0  ;;  %s564_s6 = smov 0   ;;  %s566_s7 = smov 0  }
   0x2   :  { %s568_s8 = smov 0   ;;  %s570_s9 = smov 0  }
   0x3   :  { %s572_s10 = smov 0   ;;  %s574_s11 = smov 0  }
   0x4 LB: > { %s393_s12 = sadd.s32 4294967295, %s547_s11   ;;  %s23_s13 = sadd.s32 1, %s543_s10  ;;  %s547_s11 = sphi %s574_s11, %s14_s11   ;;  %s543_s10 = sphi %s572_s10, %s782_s10   ;;  %s539_s9 = sphi %s570_s9, %s781_s9   ;;  %s535_s8 = sphi %s568_s8, %s780_s8   ;;  %s531_s7 = sphi %s566_s7, %s779_s7   ;;  %s527_s6 = sphi %s564_s6, %s778_s6  }
   0x5   : > { %p24_p0 = scmp.ge.s32.totalorder %s23_s13, 2  ;;  %s35_s14 = sadd.s32 1, %s535_s8 }
   0x6   : > { %p42_p1 = scmp.ne.s32.totalorder %s535_s8, %s531_s7  ;;  %p43_p2 = scmp.eq.s32.totalorder %s547_s11, 0 }
   0x7   : > { %s784_s13 = smov (%p24_p0, %s23_s13), 0  ;;  %p48_p4 = scmp.ne.s32.totalorder %s531_s7, %s527_s6 }
   0x8   : > { %p44_p3 = por %p43_p2, %p42_p1  ;;  %s31_s15 = ssub.s32 %s543_s10, %s784_s13 }
   0x9   : > { %p49_p5 = scmp.eq.s32.totalorder %s393_s12, 0  ;;  %p33_p6 = scmp.eq.s32.totalorder %s31_s15, 0 }
   0xa   : > { %p414_p8 = scmp.lt.s32.totalorder %s547_s11, 2  ;;  %s98_s18 = sand.u32 1, %s535_s8  }
   0xb   : > { %p603_p7 = por %p49_p5, %p48_p4  ;;  %s405_s19 = sshll.u32 %s543_s10, 9 }
   0xc   : > { %s609_s17 = scalar_select %p33_p6, %s535_s8, %s35_s14  }
   0xd   : > { %s406_s20 = smul.u32 320, %s98_s18  ;;  %s616_s23 = scalar_lea.hbm %s773_s0, %s405_s19 }
   0xe   : > { %p618_p9 = pnand %p414_p8, %p44_p3  ;;  %s625_s27 = scalar_lea.sflag [#allocation4], %s98_s18 }
   0xf   : > { %s102_s25 = scalar_lea.vmem [#allocation3], %s406_s20  ;;  %s467_s28 = scalar_lea.hbm %s616_s23, 5120 }
  0x10   : > { %s112_s26 = sshll.u32 %s102_s25, 4  ;;  %p468_p11 = scmp.ne.s32.totalorder %s616_s23, %s467_s28  ;;  %s622_s26 = int_to_ptr.vmem [resolvable:$true] %s112_s26 }
  0x11   : > { %p469_p12 = pneg %p618_p9  ;;  %s472_s2 = scalar_lea.hbm %s773_s0, 10240 }
  0x12   : > { %p473_p1 = scmp.lt.u32.totalorder %s616_s23, %s773_s0  ;;  %p474_p2 = scmp.lt.u32.totalorder %s472_s2, %s467_s28 }
  0x13   : > { %p470_p13 = pnand %p469_p12, %p468_p11  ;;  %p476_p4 = scmp.lt.u32.totalorder %s467_s28, %s616_s23 }
  0x14   : > { %p475_p3 = por %p474_p2, %p473_p1 }
  0x15   : > { %p471_p0 = pneg %p470_p13 }
  0x16   : > { %p477_p5 = por %p476_p4, %p475_p3 }
  0x18   : > { %p478_p6 = pnand %p477_p5, %p471_p0 }
  0x1a   : > { %481 = shalt.err (!%p478_p6)
}
  0x1b   : > { %s482_s5 = scalar_lea.vmem %s622_s26, 5120  ;;  %s549_s6 = smov [#allocation3]  }
  0x1c   : > { %p483_p8 = scmp.ne.s32.totalorder %s622_s26, %s482_s5  ;;  %s487_s12 = sshll.u32 %s549_s6, 4  ;;  %s488_s12 = int_to_ptr.vmem [resolvable:$false] %s487_s12 }
  0x1d   : > { %s489_s14 = scalar_lea.vmem %s488_s12, 10240  ;;  %p490_p10 = scmp.lt.s32.totalorder %s622_s26, %s488_s12 }
  0x1e   : > { %p485_p11 = pnand %p483_p8, %p469_p12  ;;  %p491_p1 = scmp.lt.s32.totalorder %s489_s14, %s482_s5 }
  0x20   : > { %p486_p13 = pneg %p485_p11  ;;  %p492_p2 = por %p491_p1, %p490_p10 }
  0x22   : > { %p493_p3 = pnand %p492_p2, %p486_p13 }
  0x24   : > { %496 = shalt.err (!%p493_p3)
}
  0x25   : > { %s550_s15 = smov 1024   ;;  %s551_s18 = smov 512  }
  0x26   : > { %s552_s19 = smov 32   ;;  %p120_p12 = scmp.lt.s32.totalorder %s547_s11, 3 }
  0x27   : > { %413 = dma.hbm_to_vmem [thread:$0]  (!%p618_p9), %s616_s23, 5120, %s622_s26, %s625_s27, %s550_s15, %s551_s18, %s552_s19  }
  0x28   : > { %p777_p0 = scmp.ge.s32.totalorder %s547_s11, 1 }
  0x2a   : > { %p121_p4 = pnand %p777_p0, %p120_p12 }
  0x2b   : > { %s126_s20 = sand.u32 (!%p121_p4), 1, %s531_s7  }
  0x2c   : > { %124 = sbr.rel (%p121_p4) target bundleno = 238 (0xee), region = 24  ;;  %s127_s22 = scalar_lea.sflag (!%p121_p4), [#allocation4], %s126_s20 }
  0x2d   : > { %s407_s21 = smul.u32 (!%p121_p4), 320, %s126_s20 }
  0x2f   : > { %s657_s25 = scalar_lea.vmem (!%p121_p4), [#allocation3], %s407_s21 }
  0x33   : > { %522 = dma.done.wait (%p603_p7), %s127_s22, 5120  }
  0x34   : > { %524 = vsyncadd (%p603_p7), %s127_s22, 4294962176  ;;  %p399_p10 = scmp.ne.s32.totalorder %s539_s9, 0 }
  0x35   : > { %vm161_vm0 = vcmask (!%p399_p10), 7168   ;;  %v553_v0 = vmov (!%p399_p10), -inf  }
  0x36   : > { %160 = sbr.rel (%p399_p10) target bundleno = 61 (0x3d), region = 32  ;;  %162 = vst.msk [vmem:[#allocation2] sm:$0xff] (!%p399_p10), %vm161_vm0, %v553_v0  ;;  %163 = vst.msk [vmem:[#allocation2 + $0x8] sm:$0xff] (!%p399_p10), %vm161_vm0, %v553_v0 }
  0x37   : > { %164 = vst.msk [vmem:[#allocation2 + $0x10] sm:$0xff] (!%p399_p10), %vm161_vm0, %v553_v0  ;;  %165 = vst.msk [vmem:[#allocation2 + $0x18] sm:$0xff] (!%p399_p10), %vm161_vm0, %v553_v0 }
  0x38   : > { %166 = vst.msk [vmem:[#allocation2 + $0x20] sm:$0xff] (!%p399_p10), %vm161_vm0, %v553_v0  ;;  %167 = vst.msk [vmem:[#allocation2 + $0x28] sm:$0xff] (!%p399_p10), %vm161_vm0, %v553_v0 }
  0x39   : > { %168 = vst.msk [vmem:[#allocation2 + $0x30] sm:$0xff] (!%p399_p10), %vm161_vm0, %v553_v0  ;;  %169 = vst.msk [vmem:[#allocation2 + $0x38] sm:$0xff] (!%p399_p10), %vm161_vm0, %v553_v0 }
  0x3a   : > { %170 = vst.msk [vmem:[#allocation2 + $0x40] sm:$0xff] (!%p399_p10), %vm161_vm0, %v553_v0  ;;  %171 = vst.msk [vmem:[#allocation2 + $0x48] sm:$0xff] (!%p399_p10), %vm161_vm0, %v553_v0 }
  0x3d PF: > { %v180_v1 = vld [vmem:[%s657_s25 + $0x40] sm:$0xff]  ;;  %v181_v2 = vld [vmem:[%s657_s25 + $0x48] sm:$0xff]  ;;  %v182_v3 = vld [vmem:[%s657_s25 + $0x50] sm:$0xff]  ;;  %vm282_vm1 = vcmask 7168   ;;  %p400_p7 = scmp.ne.s32.totalorder %s539_s9, 1 }
  0x3e   : > { %v222_v4 = vmax.f32 %v180_v1, %v181_v2  ;;  %v172_v5 = vld [vmem:[%s657_s25] sm:$0xff]  ;;  %v173_v6 = vld [vmem:[%s657_s25 + $0x8] sm:$0xff]  ;;  %v183_v7 = vld [vmem:[%s657_s25 + $0x58] sm:$0xff] }
  0x3f   : > { %v174_v8 = vld [vmem:[%s657_s25 + $0x10] sm:$0xff]  ;;  %v212_v9 = vmax.f32 %v172_v5, %v173_v6  ;;  %v184_v10 = vld [vmem:[%s657_s25 + $0x60] sm:$0xff]  ;;  %v175_v12 = vld [vmem:[%s657_s25 + $0x18] sm:$0xff] }
  0x40   : > { %v223_v11 = vmax.f32 %v222_v4, %v182_v3  ;;  %v185_v13 = vld [vmem:[%s657_s25 + $0x68] sm:$0xff]  ;;  %v186_v14 = vld [vmem:[%s657_s25 + $0x70] sm:$0xff]  ;;  %v176_v17 = vld [vmem:[%s657_s25 + $0x20] sm:$0xff] }
  0x41   : > { %v213_v15 = vmax.f32 %v212_v9, %v174_v8  ;;  %v227_v16 = vmax.f32 %v184_v10, %v185_v13  ;;  %v177_v18 = vld [vmem:[%s657_s25 + $0x28] sm:$0xff]  ;;  %v178_v19 = vld [vmem:[%s657_s25 + $0x30] sm:$0xff]  ;;  %v187_v21 = vld [vmem:[%s657_s25 + $0x78] sm:$0xff] }
  0x42   : > { %v224_v20 = vmax.f32 %v223_v11, %v183_v7  ;;  %v217_v22 = vmax.f32 %v176_v17, %v177_v18  ;;  %v192_v23 = vld [vmem:[%s657_s25 + $0xa0] sm:$0xff]  ;;  %v193_v24 = vld [vmem:[%s657_s25 + $0xa8] sm:$0xff]  ;;  %v179_v27 = vld [vmem:[%s657_s25 + $0x38] sm:$0xff] }
  0x43   : > { %v214_v25 = vmax.f32 %v213_v15, %v175_v12  ;;  %v228_v26 = vmax.f32 %v227_v16, %v186_v14  ;;  %v194_v28 = vld [vmem:[%s657_s25 + $0xb0] sm:$0xff]  ;;  %v237_v29 = vmax.f32 %v192_v23, %v193_v24  ;;  %v188_v30 = vld [vmem:[%s657_s25 + $0x80] sm:$0xff]  ;;  %v195_v32 = vld [vmem:[%s657_s25 + $0xb8] sm:$0xff] }
  0x44   : > { %225 = vmax.xlane.f32.xlu1 %v224_v20  ;;  %v218_v31 = vmax.f32 %v217_v22, %v178_v19  ;;  %v189_v33 = vld [vmem:[%s657_s25 + $0x88] sm:$0xff]  ;;  %v190_v34 = vld [vmem:[%s657_s25 + $0x90] sm:$0xff]  ;;  %v200_v38 = vld [vmem:[%s657_s25 + $0xe0] sm:$0xff] }
  0x45   : > { %215 = vmax.xlane.f32.xlu0 %v214_v25  ;;  %v229_v35 = vmax.f32 %v228_v26, %v187_v21  ;;  %v238_v36 = vmax.f32 %v237_v29, %v194_v28  ;;  %v232_v37 = vmax.f32 %v188_v30, %v189_v33  ;;  %v201_v39 = vld [vmem:[%s657_s25 + $0xe8] sm:$0xff]  ;;  %v202_v40 = vld [vmem:[%s657_s25 + $0xf0] sm:$0xff]  ;;  %v191_v42 = vld [vmem:[%s657_s25 + $0x98] sm:$0xff] }
  0x46   : > { %v219_v41 = vmax.f32 %v218_v31, %v179_v27  ;;  %v247_v43 = vmax.f32 %v200_v38, %v201_v39  ;;  %v196_v44 = vld [vmem:[%s657_s25 + $0xc0] sm:$0xff]  ;;  %v197_v45 = vld [vmem:[%s657_s25 + $0xc8] sm:$0xff]  ;;  %v198_v47 = vld [vmem:[%s657_s25 + $0xd0] sm:$0xff] }
  0x47   : > { %v233_v46 = vmax.f32 %v232_v37, %v190_v34  ;;  %v242_v48 = vmax.f32 %v196_v44, %v197_v45  ;;  %v208_v49 = vld [vmem:[%s657_s25 + $0x120] sm:$0xff]  ;;  %v239_v50 = vmax.f32 %v238_v36, %v195_v32  ;;  %v203_v51 = vld [vmem:[%s657_s25 + $0xf8] sm:$0xff]  ;;  %v209_v53 = vld [vmem:[%s657_s25 + $0x128] sm:$0xff] }
  0x48   : > { %230 = vmax.xlane.f32.xlu1 %v229_v35  ;;  %v248_v52 = vmax.f32 %v247_v43, %v202_v40  ;;  %v210_v56 = vld [vmem:[%s657_s25 + $0x130] sm:$0xff]  ;;  %v257_v57 = vmax.f32 %v208_v49, %v209_v53  ;;  %v204_v58 = vld [vmem:[%s657_s25 + $0x100] sm:$0xff]  ;;  %v205_v59 = vld [vmem:[%s657_s25 + $0x108] sm:$0xff] }
  0x49   : > { %220 = vmax.xlane.f32.xlu0 %v219_v41  ;;  %v234_v54 = vmax.f32 %v233_v46, %v191_v42  ;;  %v243_v55 = vmax.f32 %v242_v48, %v198_v47  ;;  %v199_v60 = vld [vmem:[%s657_s25 + $0xd8] sm:$0xff]  ;;  %v206_v61 = vld [vmem:[%s657_s25 + $0x110] sm:$0xff]  ;;  %v252_v62 = vmax.f32 %v204_v58, %v205_v59  ;;  %v264_v7 = vld [vmem:[#allocation2 + $0x10] sm:$0xff] }
  0x4a   : > { %v249_v63 = vmax.f32 %v248_v52, %v203_v51  ;;  %v258_v0 = vmax.f32 %v257_v57, %v210_v56  ;;  %v211_v2 = vld [vmem:[%s657_s25 + $0x138] sm:$0xff]  ;;  %v262_v8 = vld [vmem:[#allocation2] sm:$0xff]  ;;  %v265_v13 = vld [vmem:[#allocation2 + $0x18] sm:$0xff] }
  0x4b   : > { %v244_v1 = vmax.f32 %v243_v55, %v199_v60  ;;  %v253_v3 = vmax.f32 %v252_v62, %v206_v61  ;;  %v207_v4 = vld [vmem:[%s657_s25 + $0x118] sm:$0xff]  ;;  %v266_v20 = vld [vmem:[#allocation2 + $0x20] sm:$0xff]  ;;  %v269_v25 = vld [vmem:[#allocation2 + $0x38] sm:$0xff] }
  0x4c   : > { %240 = vmax.xlane.f32.xlu1 %v239_v50  ;;  %v259_v5 = vmax.f32 %v258_v0, %v211_v2  ;;  %v263_v14 = vld [vmem:[#allocation2 + $0x8] sm:$0xff]  ;;  %v268_v26 = vld [vmem:[#allocation2 + $0x30] sm:$0xff]  ;;  %v270_v32 = vld [vmem:[#allocation2 + $0x40] sm:$0xff] }
  0x4d   : > { %235 = vmax.xlane.f32.xlu0 %v234_v54  ;;  %v254_v6 = vmax.f32 %v253_v3, %v207_v4  ;;  %v267_v19 = vld [vmem:[#allocation2 + $0x28] sm:$0xff] }
  0x4e   : > { %v271_v31 = vld [vmem:[#allocation2 + $0x48] sm:$0xff] }
  0x50   : > { %250 = vmax.xlane.f32.xlu1 %v249_v63 }
  0x51   : > { %245 = vmax.xlane.f32.xlu0 %v244_v1 }
  0x54   : > { %260 = vmax.xlane.f32.xlu1 %v259_v5 }
  0x55   : > { %255 = vmax.xlane.f32.xlu0 %v254_v6 }
  0xd1   : > { %v226_v9 = vpop.xlane.xlu1 %225 }
  0xd2   : > { %v274_v10 = vmax.f32 %v264_v7, %v226_v9  ;;  %v216_v11 = vpop.xlane.xlu0 %215 }
  0xd3   : > { %v272_v12 = vmax.f32 %v262_v8, %v216_v11 }
  0xd4   : > { %285 = vst.msk [vmem:[#allocation2 + $0x10] sm:$0xff] %vm282_vm1, %v274_v10 }
  0xd5   : > { %283 = vst.msk [vmem:[#allocation2] sm:$0xff] %vm282_vm1, %v272_v12  ;;  %v231_v15 = vpop.xlane.xlu1 %230 }
  0xd6   : > { %v275_v16 = vmax.f32 %v265_v13, %v231_v15  ;;  %v221_v17 = vpop.xlane.xlu0 %220 }
  0xd7   : > { %v273_v18 = vmax.f32 %v263_v14, %v221_v17 }
  0xd8   : > { %286 = vst.msk [vmem:[#allocation2 + $0x18] sm:$0xff] %vm282_vm1, %v275_v16 }
  0xd9   : > { %284 = vst.msk [vmem:[#allocation2 + $0x8] sm:$0xff] %vm282_vm1, %v273_v18  ;;  %v241_v21 = vpop.xlane.xlu1 %240 }
  0xda   : > { %v277_v22 = vmax.f32 %v267_v19, %v241_v21  ;;  %v236_v23 = vpop.xlane.xlu0 %235 }
  0xdb   : > { %v276_v24 = vmax.f32 %v266_v20, %v236_v23  ;;  %v299_v39 = vld [vmem:[#allocation2 + $0x10] sm:$0xff] (!%p400_p7) }
  0xdc   : > { %288 = vst.msk [vmem:[#allocation2 + $0x28] sm:$0xff] %vm282_vm1, %v277_v22  ;;  %v297_v37 = vld [vmem:[#allocation2] sm:$0xff] (!%p400_p7)  ;;  %309 = vst.msk [vmem:[%s774_s1 + $0x10] sm:$0xff] (!%p400_p7), %vm282_vm1, %v299_v39 }
  0xdd   : > { %287 = vst.msk [vmem:[#allocation2 + $0x20] sm:$0xff] %vm282_vm1, %v276_v24  ;;  %v251_v27 = vpop.xlane.xlu1 %250  ;;  %307 = vst.msk [vmem:[%s774_s1] sm:$0xff] (!%p400_p7), %vm282_vm1, %v297_v37 }
  0xde   : > { %v279_v28 = vmax.f32 %v269_v25, %v251_v27  ;;  %v246_v29 = vpop.xlane.xlu0 %245 }
  0xdf   : > { %v278_v30 = vmax.f32 %v268_v26, %v246_v29  ;;  %296 = sbr.rel (%p400_p7) target bundleno = 238 (0xee), region = 36  ;;  %v300_v40 = vld [vmem:[#allocation2 + $0x18] sm:$0xff] (!%p400_p7) }
  0xe0   : > { %290 = vst.msk [vmem:[#allocation2 + $0x38] sm:$0xff] %vm282_vm1, %v279_v28  ;;  %v298_v38 = vld [vmem:[#allocation2 + $0x8] sm:$0xff] (!%p400_p7)  ;;  %310 = vst.msk [vmem:[%s774_s1 + $0x18] sm:$0xff] (!%p400_p7), %vm282_vm1, %v300_v40 }
  0xe1   : > { %289 = vst.msk [vmem:[#allocation2 + $0x30] sm:$0xff] %vm282_vm1, %v278_v30  ;;  %v261_v33 = vpop.xlane.xlu1 %260  ;;  %308 = vst.msk [vmem:[%s774_s1 + $0x8] sm:$0xff] (!%p400_p7), %vm282_vm1, %v298_v38 }
  0xe2   : > { %v281_v34 = vmax.f32 %v271_v31, %v261_v33  ;;  %v256_v35 = vpop.xlane.xlu0 %255 }
  0xe3   : > { %v280_v36 = vmax.f32 %v270_v32, %v256_v35  ;;  %v302_v42 = vld [vmem:[#allocation2 + $0x28] sm:$0xff] (!%p400_p7) }
  0xe4   : > { %292 = vst.msk [vmem:[#allocation2 + $0x48] sm:$0xff] %vm282_vm1, %v281_v34  ;;  %v301_v41 = vld [vmem:[#allocation2 + $0x20] sm:$0xff] (!%p400_p7)  ;;  %312 = vst.msk [vmem:[%s774_s1 + $0x28] sm:$0xff] (!%p400_p7), %vm282_vm1, %v302_v42 }
  0xe5   : > { %291 = vst.msk [vmem:[#allocation2 + $0x40] sm:$0xff] %vm282_vm1, %v280_v36  ;;  %311 = vst.msk [vmem:[%s774_s1 + $0x20] sm:$0xff] (!%p400_p7), %vm282_vm1, %v301_v41 }
  0xe7   : > { %v304_v44 = vld [vmem:[#allocation2 + $0x38] sm:$0xff] }
  0xe8   : > { %v303_v43 = vld [vmem:[#allocation2 + $0x30] sm:$0xff]  ;;  %314 = vst.msk [vmem:[%s774_s1 + $0x38] sm:$0xff] %vm282_vm1, %v304_v44 }
  0xe9   : > { %313 = vst.msk [vmem:[%s774_s1 + $0x30] sm:$0xff] %vm282_vm1, %v303_v43 }
  0xeb   : > { %v306_v46 = vld [vmem:[#allocation2 + $0x48] sm:$0xff] }
  0xec   : > { %v305_v45 = vld [vmem:[#allocation2 + $0x40] sm:$0xff]  ;;  %316 = vst.msk [vmem:[%s774_s1 + $0x48] sm:$0xff] %vm282_vm1, %v306_v46 }
  0xed   : > { %315 = vst.msk [vmem:[%s774_s1 + $0x40] sm:$0xff] %vm282_vm1, %v305_v45 }
  0xee PF: > { %s14_s11 = sadd.s32 1, %s547_s11   ;;  %s778_s6 = smov %s531_s7 }
  0xef   : > { %p11_p9 = scmp.ge.s32.totalorder %s14_s11, 4   ;;  %s779_s7 = smov %s535_s8 }
  0xf0   : > { %s780_s8 = smov %s609_s17  ;;  %s781_s9 = smov %s543_s10 }
  0xf1   : > { %s782_s10 = smov %s784_s13  ;;  %13 = sbr.rel (!%p11_p9) target bundleno = 4 (0x4), region = 72 }
  0xf8   :  { %339 = vsyncpa [#allocation4], 1 }
  0xf9   :  { %341 = vsyncpa [#allocation4 + $0x1], 1 }

</bundles_post_ra>
